<compile_context>
chip_gen: v6e
topology: v6e:2x2x1
jax: 0.10.0
libtpu: 0.0.40
codegen_flags: <defaults>
</compile_context>

<pallas_src>
import functools

import jax
import jax.numpy as jnp
from jax.experimental import pallas as pl
from jax.experimental.pallas import tpu as pltpu


def _round_up(x: int, m: int) -> int:
    return (x + m - 1) // m * m


def _device_kind() -> str:
    try:
        return jax.devices()[0].device_kind.lower()
    except Exception:
        return ""


# ----------------------------------------------------------------------------
# Pallas kernel: one (batch-tile, time-chunk) grid step of the recurrence.
# ----------------------------------------------------------------------------
def rnn_encoder_kernel(sched_ref,            # SMEM (2,) int32: [max_len, last_chunk]
                       emb_ref,              # VMEM (1, T_CHUNK*B_TILE, E_pad) bf16
                       len_ref,              # VMEM (1, B_TILE, 1) int32
                       wih_ref,              # VMEM (E_pad, H_pad) bf16
                       whh_ref,              # VMEM (H_pad, H_pad) bf16
                       bias_ref,             # VMEM (1, H_pad) f32 (b_ih + b_hh)
                       h_ref,                # VMEM (B_TILE, H_pad) f32 (output / carry)
                       xw_ref):              # VMEM scratch (T_CHUNK*B_TILE, H_pad) bf16
    t_idx = pl.program_id(1)                 # time-chunk index (inner, "arbitrary")

    b_tile = h_ref.shape[0]
    t_chunk = xw_ref.shape[0] // b_tile

    # Zero the resident hidden-state accumulator at the start of each batch tile.
    @pl.when(t_idx == 0)
    def _init():
        h_ref[...] = jnp.zeros_like(h_ref)

    max_len = sched_ref[0]
    chunk_start = t_idx * t_chunk

    # Skip compute for chunks lying entirely in the padding region; their DMA
    # is already skipped by the clamped index_map in the wrapper.
    @pl.when(chunk_start < max_len)
    def _compute():
        # ---- Hoisted input projection: one big bf16 GEMM for the whole chunk,
        # stored in bf16 (halves scratch VMEM + vst traffic of the writeback).
        x = emb_ref[0]                                        # [T_CHUNK*B_TILE, E_pad]
        xw_ref[...] = (jnp.dot(x, wih_ref[...],
                               preferred_element_type=jnp.float32)
                       + bias_ref[...]).astype(jnp.bfloat16)

        # Hoisted loop invariants (JAX does not CSE broadcasts inside the loop).
        lengths = len_ref[0]                                  # [B_TILE, 1] int32
        whh = whh_ref[...]                                    # [H_pad, H_pad] bf16
        # TODO(synk): pltpu.matmul_push_rhs/matmul_acc_lhs/matmul_pop could pin
        # W_hh in the MXU weight registers across the serial loop; not used here
        # to keep lowering robust across generations.

        def step(i, h):
            row = pl.multiple_of(i * b_tile, b_tile)
            xh = xw_ref[pl.ds(row, b_tile), :].astype(jnp.float32)
            pre = xh + jnp.dot(h.astype(jnp.bfloat16), whh,
                               preferred_element_type=jnp.float32)
            h_new = jnp.tanh(pre)                             # EUP
            # Packed-sequence behaviour: update only while t < length[b].
            active = (chunk_start + i) < lengths              # [B_TILE, 1] -> bcast
            return jnp.where(active, h_new, h)

        # Static trip count + unroll: masked steps past length/max_len are no-ops.
        unroll = True if t_chunk <= 16 else 8
        h_ref[...] = jax.lax.fori_loop(0, t_chunk, step, h_ref[...], unroll=unroll)


# ----------------------------------------------------------------------------
# Glue: lengths, layout-aware gather, per-generation tiling, pallas_call.
# ----------------------------------------------------------------------------
def find_lengths(messages: jnp.ndarray) -> jnp.ndarray:
    """Length = position of first eos (id 0) + 1, or T if no eos. [B] int32."""
    T = messages.shape[1]
    is_eos = messages == 0
    first_eos = jnp.argmax(is_eos, axis=1)
    has_eos = jnp.any(is_eos, axis=1)
    return jnp.where(has_eos, first_eos + 1, T).astype(jnp.int32)


def _pick_b_tile(B_pad8: int, kind: str) -> int:
    if B_pad8 >= 256 and "v6" in kind:
        return 256                                   # fill v6e's 256-wide MXU rows
    if B_pad8 > 128:
        return 128
    if "v7" in kind and B_pad8 >= 16:
        return _round_up((B_pad8 + 1) // 2, 8)       # >=2 tiles so both v7x TCs work
    return B_pad8


def _pick_t_chunk(T: int, B_TILE: int, E_pad: int, H_pad: int, budget: int) -> int:
    t_cap = 8
    for cand in (8, 16, 32, 64, 128):
        # emb double-buffer (bf16) + xw scratch (bf16)
        use = 2 * cand * B_TILE * E_pad * 2 + cand * B_TILE * H_pad * 2
        if use <= budget:
            t_cap = cand
    return max(1, min(t_cap, _round_up(max(T, 1), 8)))


def rnn_encoder_forward(message, params, lengths=None, *, t_chunk=None, b_tile=None):
    """message: [B, T] int32.  Returns [B, H] float32."""
    embedding = params["embedding"]      # [V, E] f32
    w_ih = params["w_ih"]                # [H, E]
    w_hh = params["w_hh"]                # [H, H]
    b_ih = params["b_ih"]                # [H]
    b_hh = params["b_hh"]                # [H]

    B, T = message.shape
    V, E = embedding.shape
    H = w_hh.shape[0]

    if lengths is None:
        lengths = find_lengths(message)
    lengths = lengths.astype(jnp.int32)

    kind = _device_kind()
    is_v7 = "v7" in kind

    # ---- Padded, lane-dense shapes -----------------------------------------
    E_pad = _round_up(E, 128)
    H_pad = _round_up(H, 128)

    B_pad8 = _round_up(B, 8)
    B_TILE = b_tile if b_tile is not None else _pick_b_tile(B_pad8, kind)
    B_TILE = _round_up(B_TILE, 8)
    B_pad = _round_up(B_pad8, B_TILE)
    nb = B_pad // B_TILE

    # Per-generation VMEM budgeting for the streamed chunk.
    vmem_limit = (48 if is_v7 else 64) * 1024 * 1024
    fixed = 2 * 2 * (E_pad * H_pad + H_pad * H_pad)             # double-buffered bf16 weights
    fixed += 2 * (B_TILE * H_pad * 4 + B_TILE * 4 + H_pad * 4)  # h out / lens / bias
    budget = max(vmem_limit - fixed - 8 * 1024 * 1024, 2 * 1024 * 1024)
    T_CHUNK = t_chunk if t_chunk is not None else _pick_t_chunk(T, B_TILE, E_pad, H_pad, budget)
    T_pad = _round_up(T, T_CHUNK)
    nt = T_pad // T_CHUNK

    # ---- Embedding gather directly in the streamed layout ------------------
    # (rows within a batch tile ordered t*B_TILE + b_local; only the tiny int32
    #  id array is transposed — no HBM pass over the big [*, E] tensor).
    emb_table = jnp.zeros((V, E_pad), jnp.bfloat16).at[:, :E].set(
        embedding.astype(jnp.bfloat16))
    msg = jnp.pad(message.astype(jnp.int32), ((0, B_pad - B), (0, T_pad - T)))
    msg = msg.reshape(nb, B_TILE, T_pad).transpose(0, 2, 1).reshape(nb, T_pad * B_TILE)
    emb = jnp.take(emb_table, msg, axis=0)          # [nb, T_pad*B_TILE, E_pad] bf16

    len3 = jnp.pad(lengths, (0, B_pad - B)).reshape(nb, B_TILE, 1)

    max_len = jnp.max(lengths).astype(jnp.int32)
    last_chunk = jnp.maximum((max_len + T_CHUNK - 1) // T_CHUNK - 1, 0).astype(jnp.int32)
    sched = jnp.stack([max_len, last_chunk])        # (2,) int32 -> SMEM (scalar prefetch)

    # Zero-padded weights (padded rows/cols are zero => exact math in real lanes).
    wih_t = jnp.zeros((E_pad, H_pad), jnp.bfloat16).at[:E, :H].set(
        w_ih.T.astype(jnp.bfloat16))
    whh_t = jnp.zeros((H_pad, H_pad), jnp.bfloat16).at[:H, :H].set(
        w_hh.T.astype(jnp.bfloat16))
    bias = jnp.zeros((1, H_pad), jnp.float32).at[0, :H].set(
        (b_ih + b_hh).astype(jnp.float32))

    # Advisory cost estimate (approximate, non-padded time extent).
    flops = 2 * T * B_pad * (E_pad * H_pad + H_pad * H_pad)
    transcendentals = T * B_pad * H_pad
    bytes_accessed = (emb.size * 2 + wih_t.size * 2 + whh_t.size * 2
                      + bias.size * 4 + len3.size * 4 + B_pad * H_pad * 4)

    grid_spec = pltpu.PrefetchScalarGridSpec(
        num_scalar_prefetch=1,                       # [max_len, last_chunk] -> SMEM
        grid=(nb, nt),                               # (batch tiles, time chunks)
        in_specs=[
            # Clamp the time-block index to the last active chunk: padding chunks
            # re-use the resident block, so their HBM DMA is skipped entirely.
            pl.BlockSpec((1, T_CHUNK * B_TILE, E_pad),
                         lambda b, t, sched: (b, jnp.minimum(t, sched[1]), 0)),
            pl.BlockSpec((1, B_TILE, 1), lambda b, t, sched: (b, 0, 0)),
            pl.BlockSpec((E_pad, H_pad), lambda b, t, sched: (0, 0)),
            pl.BlockSpec((H_pad, H_pad), lambda b, t, sched: (0, 0)),
            pl.BlockSpec((1, H_pad), lambda b, t, sched: (0, 0)),
        ],
        out_specs=pl.BlockSpec((B_TILE, H_pad), lambda b, t, sched: (b, 0)),
        scratch_shapes=[pltpu.VMEM((T_CHUNK * B_TILE, H_pad), jnp.bfloat16)],
    )

    out = pl.pallas_call(
        rnn_encoder_kernel,
        out_shape=jax.ShapeDtypeStruct((B_pad, H_pad), jnp.float32),
        grid_spec=grid_spec,
        compiler_params=pltpu.CompilerParams(
            dimension_semantics=("parallel", "arbitrary"),
            vmem_limit_bytes=vmem_limit),
        cost_estimate=pl.CostEstimate(flops=flops,
                                      transcendentals=transcendentals,
                                      bytes_accessed=bytes_accessed),
    )(sched, emb, len3, wih_t, whh_t, bias)

    return out[:B, :H]


# ----------------------------------------------------------------------------
# Pure-JAX reference (fp32) for correctness checking.
# ----------------------------------------------------------------------------
def rnn_encoder_reference(message, params, lengths=None):
    embedding = params["embedding"]
    w_ih, w_hh = params["w_ih"], params["w_hh"]
    b_ih, b_hh = params["b_ih"], params["b_hh"]
    B, T = message.shape
    H = w_hh.shape[0]
    if lengths is None:
        lengths = find_lengths(message)
    emb = jnp.take(embedding, message, axis=0)          # [B, T, E] f32
    h = jnp.zeros((B, H), jnp.float32)
    for t in range(T):
        h_new = jnp.tanh(emb[:, t, :] @ w_ih.T + h @ w_hh.T + b_ih + b_hh)
        h = jnp.where((t < lengths)[:, None], h_new, h)
    return h


# ----------------------------------------------------------------------------
# Deterministic parameter init (same shapes as nn.Embedding + nn.RNN, 1 layer).
# ----------------------------------------------------------------------------
def init_params(key, vocab_size, embed_dim, n_hidden):
    k0, k1, k2, k3, k4 = jax.random.split(key, 5)
    scale = 1.0 / jnp.sqrt(n_hidden)
    return {
        "embedding": jax.random.normal(k0, (vocab_size, embed_dim), jnp.float32),
        "w_ih": jax.random.uniform(k1, (n_hidden, embed_dim), jnp.float32,
                                   -scale, scale),
        "w_hh": jax.random.uniform(k2, (n_hidden, n_hidden), jnp.float32,
                                   -scale, scale),
        "b_ih": jax.random.uniform(k3, (n_hidden,), jnp.float32, -scale, scale),
        "b_hh": jax.random.uniform(k4, (n_hidden,), jnp.float32, -scale, scale),
    }


if __name__ == "__main__":
    vocab_size, embed_dim, n_hidden = 10, 16, 32

    key = jax.random.PRNGKey(0)
    k_msg, k_par, k_msg2, k_msg3 = jax.random.split(key, 4)
    params = init_params(k_par, vocab_size, embed_dim, n_hidden)

    # 1) Default small run (B=4, T=8).
    message = jax.random.randint(k_msg, (4, 8), 0, vocab_size, dtype=jnp.int32)
    out = jax.jit(rnn_encoder_forward)(message, params)
    jax.block_until_ready(out)
    assert out.shape == (4, n_hidden) and out.dtype == jnp.float32
    err = float(jnp.max(jnp.abs(out - rnn_encoder_reference(message, params))))
    assert err < 1e-1, f"test1 max abs error {err}"

    # 2) Multi-chunk path (T=32, forced T_CHUNK=8): exercises clamped
    #    padding-chunk DMA skip + masked static-trip-count recurrence.
    message2 = jax.random.randint(k_msg2, (4, 32), 0, vocab_size, dtype=jnp.int32)
    out2 = jax.jit(functools.partial(rnn_encoder_forward, t_chunk=8))(message2, params)
    jax.block_until_ready(out2)
    err2 = float(jnp.max(jnp.abs(out2 - rnn_encoder_reference(message2, params))))
    assert err2 < 1e-1, f"test2 max abs error {err2}"

    # 3) Multiple batch tiles (B=16, forced B_TILE=8): exercises the "parallel"
    #    batch-tile axis and the resident-accumulator output indexing.
    message3 = jax.random.randint(k_msg3, (16, 8), 0, vocab_size, dtype=jnp.int32)
    out3 = jax.jit(functools.partial(rnn_encoder_forward, b_tile=8))(message3, params)
    jax.block_until_ready(out3)
    err3 = float(jnp.max(jnp.abs(out3 - rnn_encoder_reference(message3, params))))
    assert err3 < 1e-1, f"test3 max abs error {err3}"

    print("KERNEL_OK")
</pallas_src>

<mosaic_0001>
module attributes {stable_mosaic.version = 11 : i64} {
  func.func @rnn_encoder_kernel(%arg0: i32, %arg1: i32, %arg2: memref<2xi32, #tpu.memory_space<smem>>, %arg3: memref<1x64x128xbf16, #tpu.memory_space<vmem>>, %arg4: memref<1x8x1xi32, #tpu.memory_space<vmem>>, %arg5: memref<128x128xbf16, #tpu.memory_space<vmem>>, %arg6: memref<128x128xbf16, #tpu.memory_space<vmem>>, %arg7: memref<1x128xf32, #tpu.memory_space<vmem>>, %arg8: memref<8x128xf32, #tpu.memory_space<vmem>>, %arg9: memref<64x128xbf16, #tpu.memory_space<vmem>>) attributes {dimension_semantics = [#tpu.dimension_semantics<parallel>, #tpu.dimension_semantics<arbitrary>], iteration_bounds = array<i64: 1, 1>, scalar_prefetch = 1 : i64, scratch_operands = 1 : i64, tpu.core_type = #tpu.core_type<tc>, window_params = [{transform_indices = @transform_0, window_bounds = array<i64: 1, 64, 128>}, {transform_indices = @transform_1, window_bounds = array<i64: 1, 8, 1>}, {pipeline_mode = #tpu.pipeline_mode<synchronous>, transform_indices = @transform_2, window_bounds = array<i64: 128, 128>}, {pipeline_mode = #tpu.pipeline_mode<synchronous>, transform_indices = @transform_3, window_bounds = array<i64: 128, 128>}, {pipeline_mode = #tpu.pipeline_mode<synchronous>, transform_indices = @transform_4, window_bounds = array<i64: 1, 128>}, {transform_indices = @transform_5, window_bounds = array<i64: 8, 128>}]} {
    %c0_i32 = arith.constant 0 : i32
    %0 = arith.cmpi eq, %arg1, %c0_i32 : i32
    %1 = arith.extui %0 : i1 to i32
    %c0_i32_0 = arith.constant 0 : i32
    %2 = arith.cmpi ne, %1, %c0_i32_0 : i32
    scf.if %2 {
      %cst = arith.constant 0.000000e+00 : f32
      %8 = vector.broadcast %cst : f32 to vector<8x128xf32>
      %c0_2 = arith.constant 0 : index
      %c0_3 = arith.constant 0 : index
      %9 = vector.load %arg8[%c0_2, %c0_3] : memref<8x128xf32, #tpu.memory_space<vmem>>, vector<8x128xf32>
      tpu.vector_store %arg8[%c0_2, %c0_3], %8 {strides = array<i32>} : memref<8x128xf32, #tpu.memory_space<vmem>>, vector<8x128xf32>,
    } else {
    }
    %c0 = arith.constant 0 : index
    %3 = memref.load %arg2[%c0] : memref<2xi32, #tpu.memory_space<smem>>
    %c8_i32 = arith.constant 8 : i32
    %4 = arith.muli %arg1, %c8_i32 : i32
    %5 = arith.cmpi slt, %4, %3 : i32
    %6 = arith.extui %5 : i1 to i32
    %c0_i32_1 = arith.constant 0 : i32
    %7 = arith.cmpi ne, %6, %c0_i32_1 : i32
    scf.if %7 {
      %c0_2 = arith.constant 0 : index
      %c0_3 = arith.constant 0 : index
      %c0_4 = arith.constant 0 : index
      %8 = vector.load %arg3[%c0_2, %c0_3, %c0_4] : memref<1x64x128xbf16, #tpu.memory_space<vmem>>, vector<1x64x128xbf16>
      %9 = vector.shape_cast %8 : vector<1x64x128xbf16> to vector<64x128xbf16>
      %c0_5 = arith.constant 0 : index
      %c0_6 = arith.constant 0 : index
      %10 = vector.load %arg5[%c0_5, %c0_6] : memref<128x128xbf16, #tpu.memory_space<vmem>>, vector<128x128xbf16>
      %cst = arith.constant dense<0.000000e+00> : vector<64x128xf32>
      %11 = tpu.matmul %9, %10, %cst {dimension_numbers = #tpu.dot_dimension_numbers<[1], [0], [0], [1], [0, 0, 1, 1], [], []>} : vector<64x128xbf16>, vector<128x128xbf16>, vector<64x128xf32> -> vector<64x128xf32>
      %c0_7 = arith.constant 0 : index
      %c0_8 = arith.constant 0 : index
      %12 = vector.load %arg7[%c0_7, %c0_8] : memref<1x128xf32, #tpu.memory_space<vmem>>, vector<1x128xf32>
      %13 = vector.broadcast %12 : vector<1x128xf32> to vector<64x128xf32>
      %14 = arith.addf %11, %13 : vector<64x128xf32>
      %15 = arith.truncf %14 : vector<64x128xf32> to vector<64x128xbf16>
      %c0_9 = arith.constant 0 : index
      %c0_10 = arith.constant 0 : index
      %16 = vector.load %arg9[%c0_9, %c0_10] : memref<64x128xbf16, #tpu.memory_space<vmem>>, vector<64x128xbf16>
      tpu.vector_store %arg9[%c0_9, %c0_10], %15 {strides = array<i32>} : memref<64x128xbf16, #tpu.memory_space<vmem>>, vector<64x128xbf16>,
      %c0_11 = arith.constant 0 : index
      %c0_12 = arith.constant 0 : index
      %c0_13 = arith.constant 0 : index
      %17 = vector.load %arg4[%c0_11, %c0_12, %c0_13] : memref<1x8x1xi32, #tpu.memory_space<vmem>>, vector<1x8x1xi32>
      %18 = vector.shape_cast %17 : vector<1x8x1xi32> to vector<8x1xi32>
      %c0_14 = arith.constant 0 : index
      %c0_15 = arith.constant 0 : index
      %19 = vector.load %arg6[%c0_14, %c0_15] : memref<128x128xbf16, #tpu.memory_space<vmem>>, vector<128x128xbf16>
      %c0_16 = arith.constant 0 : index
      %c0_17 = arith.constant 0 : index
      %20 = vector.load %arg8[%c0_16, %c0_17] : memref<8x128xf32, #tpu.memory_space<vmem>>, vector<8x128xf32>
      %c0_i32_18 = arith.constant 0 : i32
      %c8_i32_19 = arith.constant 8 : i32
      %21 = arith.muli %c0_i32_18, %c8_i32_19 : i32
      %22 = tpu.assume_multiple %21, 8 : i32
      %23 = arith.index_cast %22 : i32 to index
      %c0_20 = arith.constant 0 : index
      %24 = vector.load %arg9[%23, %c0_20] : memref<64x128xbf16, #tpu.memory_space<vmem>>, vector<8x128xbf16>
      %25 = arith.extf %24 : vector<8x128xbf16> to vector<8x128xf32>
      %26 = arith.truncf %20 : vector<8x128xf32> to vector<8x128xbf16>
      %cst_21 = arith.constant dense<0.000000e+00> : vector<8x128xf32>
      %27 = tpu.matmul %26, %19, %cst_21 {dimension_numbers = #tpu.dot_dimension_numbers<[1], [0], [0], [1], [0, 0, 1, 1], [], []>} : vector<8x128xbf16>, vector<128x128xbf16>, vector<8x128xf32> -> vector<8x128xf32>
      %28 = arith.addf %25, %27 : vector<8x128xf32>
      %29 = math.tanh %28 : vector<8x128xf32>
      %30 = arith.addi %4, %c0_i32_18 : i32
      %31 = vector.broadcast %30 : i32 to vector<8x1xi32>
      %32 = arith.cmpi slt, %31, %18 : vector<8x1xi32>
      %33 = vector.shape_cast %32 : vector<8x1xi1> to vector<8x1xi1>
      %34 = vector.broadcast %33 : vector<8x1xi1> to vector<8x128xi1>
      %35 = arith.select %34, %29, %20 : vector<8x128xi1>, vector<8x128xf32>
      %c1_i32 = arith.constant 1 : i32
      %c8_i32_22 = arith.constant 8 : i32
      %36 = arith.muli %c1_i32, %c8_i32_22 : i32
      %37 = tpu.assume_multiple %36, 8 : i32
      %38 = arith.index_cast %37 : i32 to index
      %c0_23 = arith.constant 0 : index
      %39 = vector.load %arg9[%38, %c0_23] : memref<64x128xbf16, #tpu.memory_space<vmem>>, vector<8x128xbf16>
      %40 = arith.extf %39 : vector<8x128xbf16> to vector<8x128xf32>
      %41 = arith.truncf %35 : vector<8x128xf32> to vector<8x128xbf16>
      %cst_24 = arith.constant dense<0.000000e+00> : vector<8x128xf32>
      %42 = tpu.matmul %41, %19, %cst_24 {dimension_numbers = #tpu.dot_dimension_numbers<[1], [0], [0], [1], [0, 0, 1, 1], [], []>} : vector<8x128xbf16>, vector<128x128xbf16>, vector<8x128xf32> -> vector<8x128xf32>
      %43 = arith.addf %40, %42 : vector<8x128xf32>
      %44 = math.tanh %43 : vector<8x128xf32>
      %45 = arith.addi %4, %c1_i32 : i32
      %46 = vector.broadcast %45 : i32 to vector<8x1xi32>
      %47 = arith.cmpi slt, %46, %18 : vector<8x1xi32>
      %48 = vector.shape_cast %47 : vector<8x1xi1> to vector<8x1xi1>
      %49 = vector.broadcast %48 : vector<8x1xi1> to vector<8x128xi1>
      %50 = arith.select %49, %44, %35 : vector<8x128xi1>, vector<8x128xf32>
      %c2_i32 = arith.constant 2 : i32
      %c8_i32_25 = arith.constant 8 : i32
      %51 = arith.muli %c2_i32, %c8_i32_25 : i32
      %52 = tpu.assume_multiple %51, 8 : i32
      %53 = arith.index_cast %52 : i32 to index
      %c0_26 = arith.constant 0 : index
      %54 = vector.load %arg9[%53, %c0_26] : memref<64x128xbf16, #tpu.memory_space<vmem>>, vector<8x128xbf16>
      %55 = arith.extf %54 : vector<8x128xbf16> to vector<8x128xf32>
      %56 = arith.truncf %50 : vector<8x128xf32> to vector<8x128xbf16>
      %cst_27 = arith.constant dense<0.000000e+00> : vector<8x128xf32>
      %57 = tpu.matmul %56, %19, %cst_27 {dimension_numbers = #tpu.dot_dimension_numbers<[1], [0], [0], [1], [0, 0, 1, 1], [], []>} : vector<8x128xbf16>, vector<128x128xbf16>, vector<8x128xf32> -> vector<8x128xf32>
      %58 = arith.addf %55, %57 : vector<8x128xf32>
      %59 = math.tanh %58 : vector<8x128xf32>
      %60 = arith.addi %4, %c2_i32 : i32
      %61 = vector.broadcast %60 : i32 to vector<8x1xi32>
      %62 = arith.cmpi slt, %61, %18 : vector<8x1xi32>
      %63 = vector.shape_cast %62 : vector<8x1xi1> to vector<8x1xi1>
      %64 = vector.broadcast %63 : vector<8x1xi1> to vector<8x128xi1>
      %65 = arith.select %64, %59, %50 : vector<8x128xi1>, vector<8x128xf32>
      %c3_i32 = arith.constant 3 : i32
      %c8_i32_28 = arith.constant 8 : i32
      %66 = arith.muli %c3_i32, %c8_i32_28 : i32
      %67 = tpu.assume_multiple %66, 8 : i32
      %68 = arith.index_cast %67 : i32 to index
      %c0_29 = arith.constant 0 : index
      %69 = vector.load %arg9[%68, %c0_29] : memref<64x128xbf16, #tpu.memory_space<vmem>>, vector<8x128xbf16>
      %70 = arith.extf %69 : vector<8x128xbf16> to vector<8x128xf32>
      %71 = arith.truncf %65 : vector<8x128xf32> to vector<8x128xbf16>
      %cst_30 = arith.constant dense<0.000000e+00> : vector<8x128xf32>
      %72 = tpu.matmul %71, %19, %cst_30 {dimension_numbers = #tpu.dot_dimension_numbers<[1], [0], [0], [1], [0, 0, 1, 1], [], []>} : vector<8x128xbf16>, vector<128x128xbf16>, vector<8x128xf32> -> vector<8x128xf32>
      %73 = arith.addf %70, %72 : vector<8x128xf32>
      %74 = math.tanh %73 : vector<8x128xf32>
      %75 = arith.addi %4, %c3_i32 : i32
      %76 = vector.broadcast %75 : i32 to vector<8x1xi32>
      %77 = arith.cmpi slt, %76, %18 : vector<8x1xi32>
      %78 = vector.shape_cast %77 : vector<8x1xi1> to vector<8x1xi1>
      %79 = vector.broadcast %78 : vector<8x1xi1> to vector<8x128xi1>
      %80 = arith.select %79, %74, %65 : vector<8x128xi1>, vector<8x128xf32>
      %c4_i32 = arith.constant 4 : i32
      %c8_i32_31 = arith.constant 8 : i32
      %81 = arith.muli %c4_i32, %c8_i32_31 : i32
      %82 = tpu.assume_multiple %81, 8 : i32
      %83 = arith.index_cast %82 : i32 to index
      %c0_32 = arith.constant 0 : index
      %84 = vector.load %arg9[%83, %c0_32] : memref<64x128xbf16, #tpu.memory_space<vmem>>, vector<8x128xbf16>
      %85 = arith.extf %84 : vector<8x128xbf16> to vector<8x128xf32>
      %86 = arith.truncf %80 : vector<8x128xf32> to vector<8x128xbf16>
      %cst_33 = arith.constant dense<0.000000e+00> : vector<8x128xf32>
      %87 = tpu.matmul %86, %19, %cst_33 {dimension_numbers = #tpu.dot_dimension_numbers<[1], [0], [0], [1], [0, 0, 1, 1], [], []>} : vector<8x128xbf16>, vector<128x128xbf16>, vector<8x128xf32> -> vector<8x128xf32>
      %88 = arith.addf %85, %87 : vector<8x128xf32>
      %89 = math.tanh %88 : vector<8x128xf32>
      %90 = arith.addi %4, %c4_i32 : i32
      %91 = vector.broadcast %90 : i32 to vector<8x1xi32>
      %92 = arith.cmpi slt, %91, %18 : vector<8x1xi32>
      %93 = vector.shape_cast %92 : vector<8x1xi1> to vector<8x1xi1>
      %94 = vector.broadcast %93 : vector<8x1xi1> to vector<8x128xi1>
      %95 = arith.select %94, %89, %80 : vector<8x128xi1>, vector<8x128xf32>
      %c5_i32 = arith.constant 5 : i32
      %c8_i32_34 = arith.constant 8 : i32
      %96 = arith.muli %c5_i32, %c8_i32_34 : i32
      %97 = tpu.assume_multiple %96, 8 : i32
      %98 = arith.index_cast %97 : i32 to index
      %c0_35 = arith.constant 0 : index
      %99 = vector.load %arg9[%98, %c0_35] : memref<64x128xbf16, #tpu.memory_space<vmem>>, vector<8x128xbf16>
      %100 = arith.extf %99 : vector<8x128xbf16> to vector<8x128xf32>
      %101 = arith.truncf %95 : vector<8x128xf32> to vector<8x128xbf16>
      %cst_36 = arith.constant dense<0.000000e+00> : vector<8x128xf32>
      %102 = tpu.matmul %101, %19, %cst_36 {dimension_numbers = #tpu.dot_dimension_numbers<[1], [0], [0], [1], [0, 0, 1, 1], [], []>} : vector<8x128xbf16>, vector<128x128xbf16>, vector<8x128xf32> -> vector<8x128xf32>
      %103 = arith.addf %100, %102 : vector<8x128xf32>
      %104 = math.tanh %103 : vector<8x128xf32>
      %105 = arith.addi %4, %c5_i32 : i32
      %106 = vector.broadcast %105 : i32 to vector<8x1xi32>
      %107 = arith.cmpi slt, %106, %18 : vector<8x1xi32>
      %108 = vector.shape_cast %107 : vector<8x1xi1> to vector<8x1xi1>
      %109 = vector.broadcast %108 : vector<8x1xi1> to vector<8x128xi1>
      %110 = arith.select %109, %104, %95 : vector<8x128xi1>, vector<8x128xf32>
      %c6_i32 = arith.constant 6 : i32
      %c8_i32_37 = arith.constant 8 : i32
      %111 = arith.muli %c6_i32, %c8_i32_37 : i32
      %112 = tpu.assume_multiple %111, 8 : i32
      %113 = arith.index_cast %112 : i32 to index
      %c0_38 = arith.constant 0 : index
      %114 = vector.load %arg9[%113, %c0_38] : memref<64x128xbf16, #tpu.memory_space<vmem>>, vector<8x128xbf16>
      %115 = arith.extf %114 : vector<8x128xbf16> to vector<8x128xf32>
      %116 = arith.truncf %110 : vector<8x128xf32> to vector<8x128xbf16>
      %cst_39 = arith.constant dense<0.000000e+00> : vector<8x128xf32>
      %117 = tpu.matmul %116, %19, %cst_39 {dimension_numbers = #tpu.dot_dimension_numbers<[1], [0], [0], [1], [0, 0, 1, 1], [], []>} : vector<8x128xbf16>, vector<128x128xbf16>, vector<8x128xf32> -> vector<8x128xf32>
      %118 = arith.addf %115, %117 : vector<8x128xf32>
      %119 = math.tanh %118 : vector<8x128xf32>
      %120 = arith.addi %4, %c6_i32 : i32
      %121 = vector.broadcast %120 : i32 to vector<8x1xi32>
      %122 = arith.cmpi slt, %121, %18 : vector<8x1xi32>
      %123 = vector.shape_cast %122 : vector<8x1xi1> to vector<8x1xi1>
      %124 = vector.broadcast %123 : vector<8x1xi1> to vector<8x128xi1>
      %125 = arith.select %124, %119, %110 : vector<8x128xi1>, vector<8x128xf32>
      %c7_i32 = arith.constant 7 : i32
      %c8_i32_40 = arith.constant 8 : i32
      %126 = arith.muli %c7_i32, %c8_i32_40 : i32
      %127 = tpu.assume_multiple %126, 8 : i32
      %128 = arith.index_cast %127 : i32 to index
      %c0_41 = arith.constant 0 : index
      %129 = vector.load %arg9[%128, %c0_41] : memref<64x128xbf16, #tpu.memory_space<vmem>>, vector<8x128xbf16>
      %130 = arith.extf %129 : vector<8x128xbf16> to vector<8x128xf32>
      %131 = arith.truncf %125 : vector<8x128xf32> to vector<8x128xbf16>
      %cst_42 = arith.constant dense<0.000000e+00> : vector<8x128xf32>
      %132 = tpu.matmul %131, %19, %cst_42 {dimension_numbers = #tpu.dot_dimension_numbers<[1], [0], [0], [1], [0, 0, 1, 1], [], []>} : vector<8x128xbf16>, vector<128x128xbf16>, vector<8x128xf32> -> vector<8x128xf32>
      %133 = arith.addf %130, %132 : vector<8x128xf32>
      %134 = math.tanh %133 : vector<8x128xf32>
      %135 = arith.addi %4, %c7_i32 : i32
      %136 = vector.broadcast %135 : i32 to vector<8x1xi32>
      %137 = arith.cmpi slt, %136, %18 : vector<8x1xi32>
      %138 = vector.shape_cast %137 : vector<8x1xi1> to vector<8x1xi1>
      %139 = vector.broadcast %138 : vector<8x1xi1> to vector<8x128xi1>
      %140 = arith.select %139, %134, %125 : vector<8x128xi1>, vector<8x128xf32>
      %c8_i32_43 = arith.constant 8 : i32
      %c0_44 = arith.constant 0 : index
      %c0_45 = arith.constant 0 : index
      %141 = vector.load %arg8[%c0_44, %c0_45] : memref<8x128xf32, #tpu.memory_space<vmem>>, vector<8x128xf32>
      tpu.vector_store %arg8[%c0_44, %c0_45], %140 {strides = array<i32>} : memref<8x128xf32, #tpu.memory_space<vmem>>, vector<8x128xf32>,
    } else {
    }
    return
  }
  func.func @transform_0(%arg0: i32, %arg1: i32, %arg2: memref<2xi32, #tpu.memory_space<smem>>) -> (i32, i32, i32) {
    %c1 = arith.constant 1 : index
    %0 = memref.load %arg2[%c1] : memref<2xi32, #tpu.memory_space<smem>>
    %1 = arith.minsi %arg1, %0 : i32
    %c0_i32 = arith.constant 0 : i32
    %c0_i32_0 = arith.constant 0 : i32
    return %arg0, %1, %c0_i32 : i32, i32, i32
  }
  func.func @transform_1(%arg0: i32, %arg1: i32, %arg2: memref<2xi32, #tpu.memory_space<smem>>) -> (i32, i32, i32) {
    %c0_i32 = arith.constant 0 : i32
    %c0_i32_0 = arith.constant 0 : i32
    %c0_i32_1 = arith.constant 0 : i32
    return %arg0, %c0_i32, %c0_i32_0 : i32, i32, i32
  }
  func.func @transform_2(%arg0: i32, %arg1: i32, %arg2: memref<2xi32, #tpu.memory_space<smem>>) -> (i32, i32) {
    %c0_i32 = arith.constant 0 : i32
    %c0_i32_0 = arith.constant 0 : i32
    %c0_i32_1 = arith.constant 0 : i32
    return %c0_i32, %c0_i32_0 : i32, i32
  }
  func.func @transform_3(%arg0: i32, %arg1: i32, %arg2: memref<2xi32, #tpu.memory_space<smem>>) -> (i32, i32) {
    %c0_i32 = arith.constant 0 : i32
    %c0_i32_0 = arith.constant 0 : i32
    %c0_i32_1 = arith.constant 0 : i32
    return %c0_i32, %c0_i32_0 : i32, i32
  }
  func.func @transform_4(%arg0: i32, %arg1: i32, %arg2: memref<2xi32, #tpu.memory_space<smem>>) -> (i32, i32) {
    %c0_i32 = arith.constant 0 : i32
    %c0_i32_0 = arith.constant 0 : i32
    %c0_i32_1 = arith.constant 0 : i32
    return %c0_i32, %c0_i32_0 : i32, i32
  }
  func.func @transform_5(%arg0: i32, %arg1: i32, %arg2: memref<2xi32, #tpu.memory_space<smem>>) -> (i32, i32) {
    %c0_i32 = arith.constant 0 : i32
    %c0_i32_0 = arith.constant 0 : i32
    return %arg0, %c0_i32 : i32, i32
  }
}

</mosaic_0001>

<bundles_post_ra>
// kernel: rnn_encoder_forward.1
= control target key start
LH: loop header
LB: loop body
LE: loop exit
PB: predicated region body
PF: predicated region fallthrough
CT: control target
= control target key end

     0   :  { %s1493_s0 = inlined_call_operand.vmem [shape: s32[2], index: 0, kind: input, shape index: {}]   ;;  %s1494_s1 = inlined_call_operand.vmem [shape: bf16[1,64,128], index: 1, kind: input, shape index: {}]   ;;  %s1495_s2 = inlined_call_operand.vmem [shape: s32[1,8,1], index: 2, kind: input, shape index: {}]   ;;  %s1496_s3 = inlined_call_operand.vmem [shape: bf16[128,128], index: 3, kind: input, shape index: {}]   ;;  %s1497_s4 = inlined_call_operand.vmem [shape: bf16[128,128], index: 4, kind: input, shape index: {}]   ;;  %s1498_s5 = inlined_call_operand.vmem [shape: f32[1,128], index: 5, kind: input, shape index: {}]   ;;  %s1499_s6 = inlined_call_operand.vmem [shape: f32[8,128], index: 6, kind: output, shape index: {}]  }
   0x1   :  { %s11_s23 = sshll.u32 %s1493_s0, 4  ;;  %s12_s23 = int_to_ptr.vmem [resolvable:$true] %s11_s23 }
   0x2   :  { %s1179_s24 = scalar_lea.vmem %s12_s23, 16  ;;  %p1184_p1 = scmp.lt.s32.totalorder %s12_s23, %s12_s23 }
   0x3   :  { %p1180_p0 = scmp.ne.s32.totalorder %s12_s23, %s1179_s24  ;;  %p1185_p2 = scmp.lt.s32.totalorder %s1179_s24, %s1179_s24 }
   0x5   :  { %p1186_p3 = por %p1185_p2, %p1184_p1 }
   0x7   :  { %p1187_p4 = pnand %p1186_p3, %p1180_p0 }
   0x9   :  { %1190 = shalt.err (!%p1187_p4)  }
   0xa   :  { %s1193_s25 = smov [#allocation4]  }
   0xb   :  { %14 = dma.vmem_to_smem %s12_s23, 16, %s1193_s25, [#allocation3] }
   0xc   :  { %1191 = dma.done.wait [#allocation3], 16 }
   0xd   :  { %1192 = vsyncadd [#allocation3], 4294967280 }
   0xe   :  { %16 = sfence }
   0xf   :  { %s794_s26 = sld [smem:[#allocation4 + $0x1]]  ;;  %v1194_v0 = vmov 0.0  }
  0x10   :  { %64 = vst [vmem:[%s1499_s6] sm:$0xff] %v1194_v0  ;;  %s65_s0 = sld [smem:[#allocation4]] }
  0x15   :  { %p795_p5 = scmp.gt.s32.totalorder %s794_s26, 0 }
  0x16   :  { %p799_p7 = scmp.le.s32.totalorder %s65_s0, 0 }
  0x17   :  { %s1501_s26 = smov (%p795_p5, %s794_s26), 0 }
  0x18   :  { %s796_s29 = sshll.u32 %s1501_s26, 3 }
  0x19   :  { %p51_p6 = scmp.lt.s32.totalorder %s796_s29, 7  ;;  %70 = sbr.rel (%p799_p7) target bundleno = 1778 (0x6f2), region = 29 }
  0x1b   :  { %s1503_s29 = smov (!%p51_p6, %s796_s29), 7 }
  0x1c   :  { %s797_s30 = sshll.u32 %s1503_s29, 2 }
  0x1d   :  { %s1242_s9 = scalar_lea.vmem %s1494_s1, %s797_s30 }
  0x1e   :  { %v1143_v1 = vld [vmem:[%s1496_s3 + $0x38] sm:$0xff]   ;;  %v1144_v2 = vld [vmem:[%s1496_s3 + $0x30] sm:$0xff]   ;;  %v1195_v3 = vmov 0.0   ;;  %vm1196_vm0 = vmmov 0   ;;  %v1145_v4 = vld [vmem:[%s1496_s3 + $0x28] sm:$0xff]   ;;  %v1197_v5 = vmov 0  }
  0x1f   :  { %976 = vmatprep.subr.bf16.mxu1 %v1195_v3  ;;  %952 = vmatprep.subr.bf16.mxu0 %v1143_v1  ;;  %v1260_v6 = vld [vmem:[%s1497_s4 + $0x38] sm:$0xff]   ;;  %v1267_v7 = vld [vmem:[%s1497_s4 + $0x30] sm:$0xff]   ;;  %v1146_v8 = vld [vmem:[%s1496_s3 + $0x20] sm:$0xff]  }
  0x20   :  { %992 = vmatprep.mubr.msk.bf16.mxu1 %vm1196_vm0, %v1195_v3  ;;  %953 = vmatpush3.bf16.msra.mxu0 %v1143_v1  ;;  %v1277_v9 = vld [vmem:[%s1497_s4 + $0x28] sm:$0xff]   ;;  %v1148_v10 = vld [vmem:[%s1496_s3 + $0x18] sm:$0xff]   ;;  %v1155_v11 = vld [vmem:[%s1242_s9] sm:$0xff]  }
  0x21   :  { %1141 = vset.pattern.permute.xlu0 %v1197_v5  ;;  %954 = vmatprep.subr.bf16.mxu0 %v1144_v2  ;;  %v1288_v12 = vld [vmem:[%s1497_s4 + $0x20] sm:$0xff]   ;;  %v1150_v13 = vld [vmem:[%s1496_s3 + $0x10] sm:$0xff]   ;;  %v1298_v14 = vld [vmem:[%s1497_s4 + $0x18] sm:$0xff]  }
  0x22   :  { %1142 = vset.pattern.permute.xlu1 %v1197_v5  ;;  %977 = vmatpush3.bf16.msra.mxu1 %v1260_v6  ;;  %v1303_v15 = vld [vmem:[%s1495_s2] sm:$0xff]  ;;  %v1152_v16 = vld [vmem:[%s1496_s3 + $0x8] sm:$0xff]   ;;  %v1316_v18 = vld [vmem:[%s1497_s4 + $0x10] sm:$0xff]  }
  0x23   :  { %978 = vmatprep.subr.bf16.mxu1 %v1195_v3  ;;  %968 = vmatprep.mubr.bf16.mxu0 %v1155_v11  ;;  %vm829_vm1 = vcmp.gt.s32.totalorder %v1303_v15, 0  ;;  %vm830_vm2 = vcmp.gt.s32.totalorder %v1303_v15, 1  ;;  %vm833_vm3 = vcmp.gt.s32.totalorder %v1303_v15, 4  ;;  %v1154_v20 = vld [vmem:[%s1496_s3] sm:$0xff]   ;;  %v1328_v21 = vld [vmem:[%s1497_s4 + $0x8] sm:$0xff]   ;;  %vm835_vm4 = vcmp.gt.s32.totalorder %v1303_v15, 6 }
  0x24   :  { %955 = vmatpush3.bf16.msra.mxu0 %v1144_v2  ;;  %v392_v17 = vsel %vm829_vm1, 1, %v1197_v5  ;;  %v447_v19 = vsel %vm830_vm2, 1, %v1197_v5  ;;  %v612_v22 = vsel %vm833_vm3, 1, %v1197_v5  ;;  %v1157_v23 = vld [vmem:[%s1242_s9 + $0x8] sm:$0xff]   ;;  %v1338_v24 = vld [vmem:[%s1497_s4] sm:$0xff]   ;;  %v722_v26 = vsel %vm835_vm4, 1, %v1197_v5 }
  0x25   :  { %956 = vmatprep.subr.bf16.mxu0 %v1145_v4  ;;  %394 = vperm.xlu0 %1141, %v392_v17   ;;  %v1343_v25 = vld [vmem:[%s1499_s6] sm:$0xff]  ;;  %v1161_v28 = vld [vmem:[%s1242_s9 + $0x10] sm:$0xff]   ;;  %v1162_v29 = vld [vmem:[%s1242_s9 + $0x18] sm:$0xff]   ;;  %vm831_vm6 = vcmp.gt.s32.totalorder %v1303_v15, 2  ;;  %vm832_vm7 = vcmp.gt.s32.totalorder %v1303_v15, 3  ;;  %vm834_vm8 = vcmp.gt.s32.totalorder %v1303_v15, 5 }
  0x26   :  { %979 = vmatpush3.bf16.msra.mxu1 %v1267_v7  ;;  %v299_v27 = vpack.c.bf16 %v1343_v25, %v1343_v25  ;;  %v800_v31 = vld [vmem:[%s1498_s5] ss:$0 sm:$0xff]  ;;  %v502_v62 = vsel %vm831_vm6, 1, %v1197_v5  ;;  %v557_v63 = vsel %vm832_vm7, 1, %v1197_v5  ;;  %v667_v0 = vsel %vm834_vm8, 1, %v1197_v5 }
  0x27   :  { %980 = vmatprep.subr.bf16.mxu1 %v1195_v3  ;;  %504 = vperm.xlu1 %1142, %v502_v62   ;;  %vm836_vm9 = vcmp.gt.s32.totalorder %v1303_v15, 7 }
  0x28   :  { %957 = vmatpush3.bf16.msra.mxu0 %v1145_v4  ;;  %v777_v1 = vsel %vm836_vm9, 1, %v1197_v5 }
  0x29   :  { %958 = vmatprep.subr.bf16.mxu0 %v1146_v8  ;;  %449 = vperm.xlu0 %1141, %v447_v19  }
  0x2a   :  { %981 = vmatpush3.bf16.msra.mxu1 %v1277_v9 }
  0x2b   :  { %982 = vmatprep.subr.bf16.mxu1 %v1195_v3  ;;  %559 = vperm.xlu1 %1142, %v557_v63  }
  0x2c   :  { %959 = vmatpush3.bf16.msra.mxu0 %v1146_v8 }
  0x2d   :  { %960 = vmatprep.subr.bf16.mxu0 %v1148_v10  ;;  %614 = vperm.xlu0 %1141, %v612_v22  }
  0x2e   :  { %983 = vmatpush3.bf16.msra.mxu1 %v1288_v12 }
  0x2f   :  { %984 = vmatprep.subr.bf16.mxu1 %v1195_v3  ;;  %669 = vperm.xlu1 %1142, %v667_v0  }
  0x30   :  { %961 = vmatpush3.bf16.msra.mxu0 %v1148_v10 }
  0x31   :  { %962 = vmatprep.subr.bf16.mxu0 %v1150_v13  ;;  %724 = vperm.xlu0 %1141, %v722_v26  }
  0x32   :  { %985 = vmatpush3.bf16.msra.mxu1 %v1298_v14 }
  0x33   :  { %986 = vmatprep.subr.bf16.mxu1 %v1195_v3  ;;  %779 = vperm.xlu1 %1142, %v777_v1  }
  0x34   :  { %963 = vmatpush3.bf16.msra.mxu0 %v1150_v13 }
  0x35   :  { %964 = vmatprep.subr.bf16.mxu0 %v1152_v16 }
  0x36   :  { %987 = vmatpush3.bf16.msra.mxu1 %v1316_v18 }
  0x37   :  { %988 = vmatprep.subr.bf16.mxu1 %v1195_v3 }
  0x38   :  { %965 = vmatpush3.bf16.msra.mxu0 %v1152_v16 }
  0x39   :  { %966 = vmatprep.subr.bf16.mxu0 %v1154_v20 }
  0x3a   :  { %989 = vmatpush3.bf16.msra.mxu1 %v1328_v21 }
  0x3b   :  { %990 = vmatprep.subr.bf16.mxu1 %v1195_v3 }
  0x3c   :  { %967 = vmatpush3.bf16.msra.mxu0 %v1154_v20 }
  0x3d   :  { %996 = vmatprep.subr.bf16.mxu0 %v1195_v3 }
  0x3e   :  { %991 = vmatpush3.bf16.msra.mxu1 %v1338_v24 }
  0x3f   :  { %969 = vmatmul.mubr.bf16.vlgmr.msra.gmra.mxu0 %v1157_v23  ;;  %1016 = vmatprep.subr.bf16.mxu1 %v1195_v3 }
  0x40   :  { %997 = vmatpush3.bf16.msra.mxu0 %v1260_v6  ;;  %972 = vmatprep.mubr.bf16.mxu0 %v1161_v28 }
  0x41   :  { %998 = vmatprep.subr.bf16.mxu0 %v1195_v3  ;;  %993 = vmatmul.mubr.bf16.vlgmr.msra.gmra.mxu1 %v299_v27 }
  0x42   :  { %1017 = vmatpush3.bf16.msra.mxu1 %v1260_v6  ;;  %1032 = vmatprep.mubr.msk.bf16.mxu1 %vm1196_vm0, %v1195_v3 }
  0x43   :  { %1018 = vmatprep.subr.bf16.mxu1 %v1195_v3 }
  0x44   :  { %999 = vmatpush3.bf16.msra.mxu0 %v1267_v7 }
  0x45   :  { %1000 = vmatprep.subr.bf16.mxu0 %v1195_v3 }
  0x46   :  { %1019 = vmatpush3.bf16.msra.mxu1 %v1267_v7 }
  0x47   :  { %1020 = vmatprep.subr.bf16.mxu1 %v1195_v3  ;;  %973 = vmatmul.mubr.bf16.gmra.mxu0 %v1162_v29 }
  0x48   :  { %1001 = vmatpush3.bf16.msra.mxu0 %v1277_v9  ;;  %1012 = vmatprep.mubr.msk.bf16.mxu0 %vm1196_vm0, %v1195_v3 }
  0x49   :  { %1002 = vmatprep.subr.bf16.mxu0 %v1195_v3 }
  0x4a   :  { %1021 = vmatpush3.bf16.msra.mxu1 %v1277_v9 }
  0x4b   :  { %1022 = vmatprep.subr.bf16.mxu1 %v1195_v3 }
  0x4c   :  { %1003 = vmatpush3.bf16.msra.mxu0 %v1288_v12 }
  0x4d   :  { %1004 = vmatprep.subr.bf16.mxu0 %v1195_v3 }
  0x4e   :  { %1023 = vmatpush3.bf16.msra.mxu1 %v1288_v12 }
  0x4f   :  { %1024 = vmatprep.subr.bf16.mxu1 %v1195_v3 }
  0x50   :  { %1005 = vmatpush3.bf16.msra.mxu0 %v1298_v14 }
  0x51   :  { %1006 = vmatprep.subr.bf16.mxu0 %v1195_v3 }
  0x52   :  { %1025 = vmatpush3.bf16.msra.mxu1 %v1298_v14 }
  0x53   :  { %1026 = vmatprep.subr.bf16.mxu1 %v1195_v3 }
  0x54   :  { %1007 = vmatpush3.bf16.msra.mxu0 %v1316_v18 }
  0x55   :  { %1008 = vmatprep.subr.bf16.mxu0 %v1195_v3 }
  0x56   :  { %1027 = vmatpush3.bf16.msra.mxu1 %v1316_v18 }
  0x57   :  { %1028 = vmatprep.subr.bf16.mxu1 %v1195_v3 }
  0x58   :  { %1009 = vmatpush3.bf16.msra.mxu0 %v1328_v21 }
  0x59   :  { %1010 = vmatprep.subr.bf16.mxu0 %v1195_v3 }
  0x5a   :  { %1029 = vmatpush3.bf16.msra.mxu1 %v1328_v21 }
  0x5b   :  { %1030 = vmatprep.subr.bf16.mxu1 %v1195_v3 }
  0x5c   :  { %1011 = vmatpush3.bf16.msra.mxu0 %v1338_v24 }
  0x5d   :  { %1036 = vmatprep.subr.bf16.mxu0 %v1195_v3 }
  0x5e   :  { %1031 = vmatpush3.bf16.msra.mxu1 %v1338_v24 }
  0x5f   :  { %1056 = vmatprep.subr.bf16.mxu1 %v1195_v3 }
  0xa0   :  { %v395_v48 = vpop.permute.xlu0 %394 }
  0xa1   :  { %vm396_vm5 = vcmp.eq.s32.totalorder %v395_v48, 1 }
  0xa2   :  { %v505_v28 = vpop.permute.xlu1 %504 }
  0xa3   :  { %vm506_vm11 = vcmp.eq.s32.totalorder %v505_v28, 1 }
  0xa4   :  { %v450_v16 = vpop.permute.xlu0 %449 }
  0xa5   :  { %vm451_vm10 = vcmp.eq.s32.totalorder %v450_v16, 1 }
  0xff   :  { %v970_v30 = vpop.f32.mrf.mxu0 }
 0x100   :  { %v217_v35 = vadd.f32 %v970_v30, %v800_v31 }
 0x101   :  { %v208_v32 = vpop.f32.mrf.mxu0  ;;  %v382_v33 = vpop.f32.mrf.mxu1 }
 0x102   :  { %v209_v39 = vadd.f32 %v800_v31, %v208_v32 }
 0x103   :  { %v971_v34 = vpop.f32.mrf.mxu0  ;;  %v994_v37 = vpop.f32.mrf.mxu1 }
 0x104   :  { %v220_v36 = vadd.f32 %v971_v34, %v800_v31 }
 0x105   :  { %v211_v38 = vpop.f32.mrf.mxu0  ;;  %v385_v42 = vpop.f32.mrf.mxu1 }
 0x106   :  { %v853_v40 = vpack.c.bf16 %v220_v36, %v217_v35  ;;  %v212_v41 = vadd.f32 %v800_v31, %v211_v38  ;;  %v560_v38 = vpop.permute.xlu1 %559 }
 0x107   :  { %v995_v44 = vpop.f32.mrf.mxu1  ;;  %v974_v52 = vpop.f32.mrf.mxu0  ;;  %vm561_vm12 = vcmp.eq.s32.totalorder %v560_v38, 1 }
 0x108   :  { %865 = vst [vmem:[#allocation2 + $0x8] sm:$0xff] %v853_v40   ;;  %v848_v43 = vpack.c.bf16 %v212_v41, %v209_v39  ;;  %v233_v54 = vadd.f32 %v974_v52, %v800_v31 }
 0x109   :  { %v224_v53 = vpop.f32.mrf.mxu0 }
 0x10a   :  { %849 = vst [vmem:[#allocation2] sm:$0xff] %v848_v43   ;;  %v225_v56 = vadd.f32 %v800_v31, %v224_v53 }
 0x10b   :  { %v975_v55 = vpop.f32.mrf.mxu0 }
 0x10c   :  { %v236_v57 = vadd.f32 %v975_v55, %v800_v31 }
 0x10d   :  { %v227_v58 = vpop.f32.mrf.mxu0 }
 0x10e   :  { %v863_v59 = vpack.c.bf16 %v236_v57, %v233_v54  ;;  %v228_v60 = vadd.f32 %v800_v31, %v227_v58 }
 0x10f   :  { %v454_v5 = vld [vmem:[#allocation2 + $0x8] sm:$0xff]  }
 0x110   :  { %867 = vst [vmem:[#allocation2 + $0x18] sm:$0xff] %v863_v59   ;;  %v858_v61 = vpack.c.bf16 %v228_v60, %v225_v56  ;;  %v455_v15 = vunpack.c.l.bf16 %v454_v5  ;;  %v510_v32 = vunpack.c.h.bf16 %v454_v5 }
 0x111   :  { %v297_v45 = vld [vmem:[#allocation2] sm:$0xff]  }
 0x112   :  { %v298_v46 = vunpack.c.l.bf16 %v297_v45  ;;  %866 = vst [vmem:[#allocation2 + $0x10] sm:$0xff] %v858_v61   ;;  %v400_v2 = vunpack.c.h.bf16 %v297_v45 }
 0x114   :  { %v388_v47 = vadd.f32 %v382_v33, %v298_v46 }
 0x116   :  { %1163 = vtanh.f32 %v388_v47 }
 0x117   :  { %v674_v57 = vld [vmem:[#allocation2 + $0x18] sm:$0xff]  }
 0x118   :  { %v675_v58 = vunpack.c.l.bf16 %v674_v57  ;;  %v730_v1 = vunpack.c.h.bf16 %v674_v57 }
 0x119   :  { %v564_v42 = vld [vmem:[#allocation2 + $0x10] sm:$0xff]  }
 0x11a   :  { %v565_v43 = vunpack.c.l.bf16 %v564_v42 }
 0x123   :  { %v1164_v49 = vpop.eup %1163 }
 0x124   :  { %v397_v50 = vsel %vm396_vm5, %v1164_v49, %v1343_v25  ;;  %v615_v49 = vpop.permute.xlu0 %614 }
 0x125   :  { %v401_v51 = vpack.c.bf16 %v397_v50, %v397_v50  ;;  %vm616_vm13 = vcmp.eq.s32.totalorder %v615_v49, 1 }
 0x127   :  { %1013 = vmatmul.mubr.bf16.vlgmr.msra.gmra.mxu0 %v401_v51 }
 0x128   :  { %1037 = vmatpush3.bf16.msra.mxu0 %v1260_v6  ;;  %1052 = vmatprep.mubr.msk.bf16.mxu0 %vm1196_vm0, %v1195_v3  ;;  %v725_v61 = vpop.permute.xlu0 %724 }
 0x129   :  { %1038 = vmatprep.subr.bf16.mxu0 %v1195_v3  ;;  %vm726_vm15 = vcmp.eq.s32.totalorder %v725_v61, 1 }
 0x12c   :  { %1039 = vmatpush3.bf16.msra.mxu0 %v1267_v7 }
 0x12d   :  { %1040 = vmatprep.subr.bf16.mxu0 %v1195_v3 }
 0x130   :  { %1041 = vmatpush3.bf16.msra.mxu0 %v1277_v9 }
 0x131   :  { %1042 = vmatprep.subr.bf16.mxu0 %v1195_v3 }
 0x134   :  { %1043 = vmatpush3.bf16.msra.mxu0 %v1288_v12 }
 0x135   :  { %1044 = vmatprep.subr.bf16.mxu0 %v1195_v3 }
 0x138   :  { %1045 = vmatpush3.bf16.msra.mxu0 %v1298_v14 }
 0x139   :  { %1046 = vmatprep.subr.bf16.mxu0 %v1195_v3 }
 0x13c   :  { %1047 = vmatpush3.bf16.msra.mxu0 %v1316_v18 }
 0x13d   :  { %1048 = vmatprep.subr.bf16.mxu0 %v1195_v3 }
 0x140   :  { %1049 = vmatpush3.bf16.msra.mxu0 %v1328_v21 }
 0x141   :  { %1050 = vmatprep.subr.bf16.mxu0 %v1195_v3 }
 0x144   :  { %1051 = vmatpush3.bf16.msra.mxu0 %v1338_v24 }
 0x145   :  { %1076 = vmatprep.subr.bf16.mxu0 %v1195_v3 }
 0x1e7   :  { %v436_v4 = vpop.f32.mrf.mxu0 }
 0x1e8   :  { %v442_v8 = vadd.f32 %v436_v4, %v400_v2 }
 0x1e9   :  { %v1014_v10 = vpop.f32.mrf.mxu0 }
 0x1ea   :  { %1165 = vtanh.f32 %v442_v8 }
 0x1eb   :  { %v439_v11 = vpop.f32.mrf.mxu0 }
 0x1ed   :  { %v1015_v13 = vpop.f32.mrf.mxu0 }
 0x1f7   :  { %v1166_v17 = vpop.eup %1165 }
 0x1f8   :  { %v452_v19 = vsel %vm451_vm10, %v1166_v17, %v397_v50 }
 0x1f9   :  { %v456_v20 = vpack.c.bf16 %v452_v19, %v452_v19 }
 0x1fb   :  { %1033 = vmatmul.mubr.bf16.vlgmr.msra.gmra.mxu1 %v456_v20 }
 0x1fc   :  { %1057 = vmatpush3.bf16.msra.mxu1 %v1260_v6  ;;  %1072 = vmatprep.mubr.msk.bf16.mxu1 %vm1196_vm0, %v1195_v3 }
 0x1fd   :  { %1058 = vmatprep.subr.bf16.mxu1 %v1195_v3 }
 0x200   :  { %1059 = vmatpush3.bf16.msra.mxu1 %v1267_v7 }
 0x201   :  { %1060 = vmatprep.subr.bf16.mxu1 %v1195_v3 }
 0x204   :  { %1061 = vmatpush3.bf16.msra.mxu1 %v1277_v9 }
 0x205   :  { %1062 = vmatprep.subr.bf16.mxu1 %v1195_v3 }
 0x208   :  { %1063 = vmatpush3.bf16.msra.mxu1 %v1288_v12 }
 0x209   :  { %1064 = vmatprep.subr.bf16.mxu1 %v1195_v3 }
 0x20c   :  { %1065 = vmatpush3.bf16.msra.mxu1 %v1298_v14 }
 0x20d   :  { %1066 = vmatprep.subr.bf16.mxu1 %v1195_v3 }
 0x210   :  { %1067 = vmatpush3.bf16.msra.mxu1 %v1316_v18 }
 0x211   :  { %1068 = vmatprep.subr.bf16.mxu1 %v1195_v3 }
 0x214   :  { %1069 = vmatpush3.bf16.msra.mxu1 %v1328_v21 }
 0x215   :  { %1070 = vmatprep.subr.bf16.mxu1 %v1195_v3 }
 0x218   :  { %1071 = vmatpush3.bf16.msra.mxu1 %v1338_v24 }
 0x219   :  { %1096 = vmatprep.subr.bf16.mxu1 %v1195_v3 }
 0x2bb   :  { %v491_v22 = vpop.f32.mrf.mxu1 }
 0x2bc   :  { %v497_v23 = vadd.f32 %v491_v22, %v455_v15 }
 0x2bd   :  { %v1034_v25 = vpop.f32.mrf.mxu1 }
 0x2be   :  { %1167 = vtanh.f32 %v497_v23 }
 0x2bf   :  { %v494_v26 = vpop.f32.mrf.mxu1 }
 0x2c1   :  { %v1035_v27 = vpop.f32.mrf.mxu1 }
 0x2cb   :  { %v1168_v29 = vpop.eup %1167 }
 0x2cc   :  { %v507_v30 = vsel %vm506_vm11, %v1168_v29, %v452_v19 }
 0x2cd   :  { %v511_v31 = vpack.c.bf16 %v507_v30, %v507_v30 }
 0x2cf   :  { %1053 = vmatmul.mubr.bf16.vlgmr.msra.gmra.mxu0 %v511_v31 }
 0x2d0   :  { %1077 = vmatpush3.bf16.msra.mxu0 %v1260_v6  ;;  %1092 = vmatprep.mubr.msk.bf16.mxu0 %vm1196_vm0, %v1195_v3 }
 0x2d1   :  { %1078 = vmatprep.subr.bf16.mxu0 %v1195_v3 }
 0x2d4   :  { %1079 = vmatpush3.bf16.msra.mxu0 %v1267_v7 }
 0x2d5   :  { %1080 = vmatprep.subr.bf16.mxu0 %v1195_v3 }
 0x2d8   :  { %1081 = vmatpush3.bf16.msra.mxu0 %v1277_v9 }
 0x2d9   :  { %1082 = vmatprep.subr.bf16.mxu0 %v1195_v3 }
 0x2dc   :  { %1083 = vmatpush3.bf16.msra.mxu0 %v1288_v12 }
 0x2dd   :  { %1084 = vmatprep.subr.bf16.mxu0 %v1195_v3 }
 0x2e0   :  { %1085 = vmatpush3.bf16.msra.mxu0 %v1298_v14 }
 0x2e1   :  { %1086 = vmatprep.subr.bf16.mxu0 %v1195_v3 }
 0x2e4   :  { %1087 = vmatpush3.bf16.msra.mxu0 %v1316_v18 }
 0x2e5   :  { %1088 = vmatprep.subr.bf16.mxu0 %v1195_v3 }
 0x2e8   :  { %1089 = vmatpush3.bf16.msra.mxu0 %v1328_v21 }
 0x2e9   :  { %1090 = vmatprep.subr.bf16.mxu0 %v1195_v3 }
 0x2ec   :  { %1091 = vmatpush3.bf16.msra.mxu0 %v1338_v24 }
 0x2ed   :  { %1116 = vmatprep.subr.bf16.mxu0 %v1195_v3 }
 0x38f   :  { %v546_v33 = vpop.f32.mrf.mxu0 }
 0x390   :  { %v552_v34 = vadd.f32 %v546_v33, %v510_v32 }
 0x391   :  { %v1054_v35 = vpop.f32.mrf.mxu0 }
 0x392   :  { %1169 = vtanh.f32 %v552_v34 }
 0x393   :  { %v549_v36 = vpop.f32.mrf.mxu0 }
 0x395   :  { %v1055_v37 = vpop.f32.mrf.mxu0 }
 0x39f   :  { %v1170_v39 = vpop.eup %1169 }
 0x3a0   :  { %v562_v40 = vsel %vm561_vm12, %v1170_v39, %v507_v30 }
 0x3a1   :  { %v566_v41 = vpack.c.bf16 %v562_v40, %v562_v40 }
 0x3a3   :  { %1073 = vmatmul.mubr.bf16.vlgmr.msra.gmra.mxu1 %v566_v41 }
 0x3a4   :  { %1097 = vmatpush3.bf16.msra.mxu1 %v1260_v6  ;;  %1112 = vmatprep.mubr.msk.bf16.mxu1 %vm1196_vm0, %v1195_v3 }
 0x3a5   :  { %1098 = vmatprep.subr.bf16.mxu1 %v1195_v3 }
 0x3a8   :  { %1099 = vmatpush3.bf16.msra.mxu1 %v1267_v7 }
 0x3a9   :  { %1100 = vmatprep.subr.bf16.mxu1 %v1195_v3 }
 0x3ac   :  { %1101 = vmatpush3.bf16.msra.mxu1 %v1277_v9 }
 0x3ad   :  { %1102 = vmatprep.subr.bf16.mxu1 %v1195_v3 }
 0x3b0   :  { %1103 = vmatpush3.bf16.msra.mxu1 %v1288_v12 }
 0x3b1   :  { %1104 = vmatprep.subr.bf16.mxu1 %v1195_v3 }
 0x3b4   :  { %1105 = vmatpush3.bf16.msra.mxu1 %v1298_v14 }
 0x3b5   :  { %1106 = vmatprep.subr.bf16.mxu1 %v1195_v3 }
 0x3b8   :  { %1107 = vmatpush3.bf16.msra.mxu1 %v1316_v18 }
 0x3b9   :  { %1108 = vmatprep.subr.bf16.mxu1 %v1195_v3 }
 0x3bc   :  { %1109 = vmatpush3.bf16.msra.mxu1 %v1328_v21 }
 0x3bd   :  { %1110 = vmatprep.subr.bf16.mxu1 %v1195_v3 }
 0x3c0   :  { %1111 = vmatpush3.bf16.msra.mxu1 %v1338_v24 }
 0x463   :  { %v601_v44 = vpop.f32.mrf.mxu1 }
 0x464   :  { %v607_v45 = vadd.f32 %v601_v44, %v565_v43 }
 0x465   :  { %v1074_v46 = vpop.f32.mrf.mxu1 }
 0x466   :  { %1171 = vtanh.f32 %v607_v45 }
 0x467   :  { %v604_v47 = vpop.f32.mrf.mxu1 }
 0x469   :  { %v1075_v48 = vpop.f32.mrf.mxu1 }
 0x473   :  { %v1172_v50 = vpop.eup %1171 }
 0x474   :  { %v617_v51 = vsel %vm616_vm13, %v1172_v50, %v562_v40 }
 0x475   :  { %v621_v52 = vpack.c.bf16 %v617_v51, %v617_v51 }
 0x477   :  { %1093 = vmatmul.mubr.bf16.vlgmr.msra.gmra.mxu0 %v621_v52 }
 0x478   :  { %1117 = vmatpush3.bf16.msra.mxu0 %v1260_v6  ;;  %1132 = vmatprep.mubr.msk.bf16.mxu0 %vm1196_vm0, %v1195_v3  ;;  %v620_v6 = vunpack.c.h.bf16 %v564_v42 }
 0x479   :  { %1118 = vmatprep.subr.bf16.mxu0 %v1195_v3 }
 0x47c   :  { %1119 = vmatpush3.bf16.msra.mxu0 %v1267_v7 }
 0x47d   :  { %1120 = vmatprep.subr.bf16.mxu0 %v1195_v3 }
 0x480   :  { %1121 = vmatpush3.bf16.msra.mxu0 %v1277_v9 }
 0x481   :  { %1122 = vmatprep.subr.bf16.mxu0 %v1195_v3 }
 0x484   :  { %1123 = vmatpush3.bf16.msra.mxu0 %v1288_v12 }
 0x485   :  { %1124 = vmatprep.subr.bf16.mxu0 %v1195_v3 }
 0x488   :  { %1125 = vmatpush3.bf16.msra.mxu0 %v1298_v14  ;;  %v670_v14 = vpop.permute.xlu1 %669 }
 0x489   :  { %1126 = vmatprep.subr.bf16.mxu0 %v1195_v3  ;;  %vm671_vm14 = vcmp.eq.s32.totalorder %v670_v14, 1 }
 0x48c   :  { %1127 = vmatpush3.bf16.msra.mxu0 %v1316_v18  ;;  %v780_v13 = vpop.permute.xlu1 %779 }
 0x48d   :  { %1128 = vmatprep.subr.bf16.mxu0 %v1195_v3  ;;  %vm781_vm0 = vcmp.eq.s32.totalorder %v780_v13, 1 }
 0x490   :  { %1129 = vmatpush3.bf16.msra.mxu0 %v1328_v21 }
 0x491   :  { %1130 = vmatprep.subr.bf16.mxu0 %v1195_v3 }
 0x494   :  { %1131 = vmatpush3.bf16.msra.mxu0 %v1338_v24 }
 0x537   :  { %v656_v7 = vpop.f32.mrf.mxu0 }
 0x538   :  { %v662_v9 = vadd.f32 %v656_v7, %v620_v6 }
 0x539   :  { %v1094_v12 = vpop.f32.mrf.mxu0 }
 0x53a   :  { %1173 = vtanh.f32 %v662_v9 }
 0x53b   :  { %v659_v53 = vpop.f32.mrf.mxu0 }
 0x53d   :  { %v1095_v54 = vpop.f32.mrf.mxu0 }
 0x547   :  { %v1174_v55 = vpop.eup %1173 }
 0x548   :  { %v672_v56 = vsel %vm671_vm14, %v1174_v55, %v617_v51 }
 0x549   :  { %v676_v18 = vpack.c.bf16 %v672_v56, %v672_v56 }
 0x54b   :  { %1113 = vmatmul.mubr.bf16.vlgmr.msra.gmra.mxu1 %v676_v18 }
 0x60b   :  { %v711_v21 = vpop.f32.mrf.mxu1 }
 0x60c   :  { %v717_v59 = vadd.f32 %v711_v21, %v675_v58 }
 0x60d   :  { %v1114_v3 = vpop.f32.mrf.mxu1 }
 0x60e   :  { %1175 = vtanh.f32 %v717_v59 }
 0x60f   :  { %v714_v24 = vpop.f32.mrf.mxu1 }
 0x611   :  { %v1115_v60 = vpop.f32.mrf.mxu1 }
 0x61b   :  { %v1176_v62 = vpop.eup %1175 }
 0x61c   :  { %v727_v63 = vsel %vm726_vm15, %v1176_v62, %v672_v56 }
 0x61d   :  { %v731_v0 = vpack.c.bf16 %v727_v63, %v727_v63 }
 0x61f   :  { %1133 = vmatmul.mubr.bf16.vlgmr.msra.gmra.mxu0 %v731_v0 }
 0x6df   :  { %v766_v2 = vpop.f32.mrf.mxu0 }
 0x6e0   :  { %v772_v4 = vadd.f32 %v766_v2, %v730_v1 }
 0x6e1   :  { %v1134_v8 = vpop.f32.mrf.mxu0 }
 0x6e2   :  { %1177 = vtanh.f32 %v772_v4 }
 0x6e3   :  { %v769_v10 = vpop.f32.mrf.mxu0 }
 0x6e5   :  { %v1135_v11 = vpop.f32.mrf.mxu0 }
 0x6ef   :  { %v1178_v16 = vpop.eup %1177 }
 0x6f0   :  { %v782_v17 = vsel %vm781_vm0, %v1178_v16, %v727_v63 }
 0x6f1   :  { %783 = vst [vmem:[%s1499_s6] sm:$0xff] %v782_v17 }
 0x6f2 PF:  {}

</bundles_post_ra>
